<compile_context>
chip_gen: v7x
topology: tpu7x:2x2x1
jax: 0.10.0
libtpu: 0.0.40
codegen_flags: <defaults>
</compile_context>

<pallas_src>
import functools

import jax
import jax.numpy as jnp
from jax.experimental import pallas as pl
from jax.experimental.pallas import tpu as pltpu


def _network_kernel(x_ref, wt_ref, b_ref, y_ref,   # inputs
                    partial_ref,                    # output: per-batch partial SSE
                    acc_ref,                        # scratch: [C_out, tile] f32
                    *, c_in, tile):
    """Fused 1x1-conv head + MSE partial-loss.

    Grid = (B, HW // tile).  Axis 0 (batch) is parallel (output varies with it);
    axis 1 (pixel tiles) is a reduction handled by the resident accumulator.
    Layout: channels on sublanes, pixels on lanes.
    """
    j = pl.program_id(1)

    @pl.when(j == 0)
    def _init():
        acc_ref[...] = jnp.zeros_like(acc_ref)

    x = x_ref[...]          # [C_in, tile]
    wt = wt_ref[...]        # [C_out, C_in]
    b = b_ref[...]          # [C_out, 1]
    y = y_ref[...]          # [C_out, tile]

    # --- model: 1x1 conv as C_in broadcast-FMAs on the VPU.
    # K=C_in is far too small for the MXU; this keeps the loop off the
    # vmatmul/pop path entirely.
    preds = wt[:, 0:1] * x[0:1, :]
    for c in range(1, c_in):
        preds = preds + wt[:, c:c + 1] * x[c:c + 1, :]
    preds = preds + b       # bias: lane-broadcast of a [C_out, 1] column

    # --- loss: elementwise squared-error accumulation (pure VPU, no reduce).
    diff = preds - y
    acc_ref[...] += diff * diff

    @pl.when(j == pl.num_programs(1) - 1)
    def _finalize():
        acc = acc_ref[...]                      # [C_out, tile]
        folded = acc[:, 0:128]                  # fold lane chunks (vreg-aligned)
        for c in range(1, tile // 128):
            folded = folded + acc[:, c * 128:(c + 1) * 128]
        partial_ref[...] = folded               # [C_out, 128], lane-dense


def network_forward(iteration, save, viz_split, xs, ys, *, params, tm=2048):
    """JAX/Pallas equivalent of Network.forward (returns the scalar loss).

    iteration / save / viz_split are accepted for signature parity with the
    PyTorch module; the synthetic MSE criterion does not use them.
    xs : tuple with one NCHW tensor [B, C_in, H, W]
    ys : tuple with one NCHW tensor [B, C_out, H, W]
    """
    del iteration, save, viz_split  # unused by the synthetic MSE criterion

    (x_nchw,) = xs
    (y_nchw,) = ys
    w, b = params["w"], params["b"]          # w: [C_in, C_out], b: [1, C_out]

    B, C_in, H, W = x_nchw.shape
    C_out = w.shape[1]
    HW = H * W

    # Channels-on-sublanes / pixels-on-lanes: pure reshape, no HBM transpose.
    x3 = x_nchw.reshape(B, C_in, HW)
    y3 = y_nchw.reshape(B, C_out, HW)

    # Tiny host-side parameter relayout (C_in x C_out matrices only).
    wt = jnp.transpose(w)                    # [C_out, C_in]
    bc = jnp.reshape(b, (C_out, 1))          # [C_out, 1]

    assert HW % 128 == 0, "H*W must be a multiple of 128 (lane width)"
    # Largest lane tile <= tm that divides HW (keeps every access lane-dense).
    # TODO(synk): masked tail handling for H*W not divisible by the tile.
    tile = min(tm, HW)
    while HW % tile != 0:
        tile -= 128
    grid = (B, HW // tile)

    kernel = functools.partial(_network_kernel, c_in=C_in, tile=tile)

    partial = pl.pallas_call(
        kernel,
        out_shape=jax.ShapeDtypeStruct((B, C_out, 128), jnp.float32),
        grid_spec=pltpu.PrefetchScalarGridSpec(
            num_scalar_prefetch=0,
            grid=grid,
            in_specs=[
                pl.BlockSpec((None, C_in, tile), lambda bi, j: (bi, 0, j)),   # x
                pl.BlockSpec((C_out, C_in), lambda bi, j: (0, 0)),            # w^T
                pl.BlockSpec((C_out, 1), lambda bi, j: (0, 0)),               # bias
                pl.BlockSpec((None, C_out, tile), lambda bi, j: (bi, 0, j)),  # y
            ],
            out_specs=pl.BlockSpec((None, C_out, 128), lambda bi, j: (bi, 0, 0)),
            scratch_shapes=[pltpu.VMEM((C_out, tile), jnp.float32)],          # SSE acc
        ),
        compiler_params=pltpu.CompilerParams(
            # batch axis: parallel (megacore / v7x second TC); pixel-tile axis:
            # reduction into the resident per-batch accumulator -> arbitrary.
            dimension_semantics=("parallel", "arbitrary"),
            # Explicit VMEM budget with ample headroom; safe on v5e/v6e/v7x.
            vmem_limit_bytes=32 * 1024 * 1024,
        ),
    )(x3, wt, bc, y3)

    inv_n = 1.0 / float(B * C_out * HW)
    return jnp.sum(partial) * inv_n


def make_params(c_in, c_out):
    """Deterministic synthetic parameters for the 1x1-conv model head."""
    kw, kb = jax.random.split(jax.random.PRNGKey(42))
    w = (jax.random.normal(kw, (c_in, c_out), jnp.float32)
         / jnp.sqrt(jnp.float32(c_in)))
    b = 0.1 * jax.random.normal(kb, (1, c_out), jnp.float32)
    return {"w": w, "b": b}


def reference_forward(xs, ys, params):
    """Pure-JAX reference for correctness check."""
    (x,) = xs
    (y,) = ys
    B, C_in, H, W = x.shape
    C_out = params["w"].shape[1]
    xf = jnp.transpose(x, (0, 2, 3, 1)).reshape(-1, C_in)
    yf = jnp.transpose(y, (0, 2, 3, 1)).reshape(-1, C_out)
    preds = xf @ params["w"] + params["b"]
    return jnp.mean((preds - yf) ** 2)


if __name__ == "__main__":
    B, C_in, C_out, Hh, Ww = 2, 4, 8, 16, 16

    key = jax.random.PRNGKey(0)
    kx, ky = jax.random.split(key)
    x = jax.random.normal(kx, (B, C_in, Hh, Ww), jnp.float32)   # xs[0], NCHW
    y = jax.random.normal(ky, (B, C_out, Hh, Ww), jnp.float32)  # ys[0], NCHW

    params = make_params(C_in, C_out)

    loss = network_forward(iteration=0, save=False, viz_split="valid",
                           xs=(x,), ys=(y,), params=params)
    loss = jax.block_until_ready(loss)

    ref = reference_forward((x,), (y,), params)
    assert jnp.allclose(loss, ref, rtol=1e-5, atol=1e-5), (loss, ref)

    # TODO(synk): original Network delegates to arbitrary injected model/loss
    # callables; only the concrete synthetic (1x1-conv + MSE) pair is here.
    # bf16 input streaming was left out to preserve f32 reference semantics.
    print("KERNEL_OK")
</pallas_src>

<mosaic_0001>
module attributes {stable_mosaic.version = 11 : i64} {
  func.func @_network_kernel(%arg0: i32, %arg1: i32, %arg2: memref<1x4x256xf32, #tpu.memory_space<vmem>>, %arg3: memref<8x4xf32, #tpu.memory_space<vmem>>, %arg4: memref<8x1xf32, #tpu.memory_space<vmem>>, %arg5: memref<1x8x256xf32, #tpu.memory_space<vmem>>, %arg6: memref<1x8x128xf32, #tpu.memory_space<vmem>>, %arg7: memref<8x256xf32, #tpu.memory_space<vmem>>) attributes {dimension_semantics = [#tpu.dimension_semantics<parallel>, #tpu.dimension_semantics<arbitrary>], iteration_bounds = array<i64: 2, 1>, scalar_prefetch = 0 : i64, scratch_operands = 1 : i64, tpu.core_type = #tpu.core_type<tc>, window_params = [{transform_indices = @transform_0, window_bounds = array<i64: 1, 4, 256>}, {pipeline_mode = #tpu.pipeline_mode<synchronous>, transform_indices = @transform_1, window_bounds = array<i64: 8, 4>}, {pipeline_mode = #tpu.pipeline_mode<synchronous>, transform_indices = @transform_2, window_bounds = array<i64: 8, 1>}, {transform_indices = @transform_3, window_bounds = array<i64: 1, 8, 256>}, {transform_indices = @transform_4, window_bounds = array<i64: 1, 8, 128>}]} {
    %c0_i32 = arith.constant 0 : i32
    %0 = arith.cmpi eq, %arg1, %c0_i32 : i32
    %1 = arith.extui %0 : i1 to i32
    %c0_i32_0 = arith.constant 0 : i32
    %2 = arith.cmpi ne, %1, %c0_i32_0 : i32
    scf.if %2 {
      %cst = arith.constant 0.000000e+00 : f32
      %42 = vector.broadcast %cst : f32 to vector<8x256xf32>
      %c0_16 = arith.constant 0 : index
      %c0_17 = arith.constant 0 : index
      %43 = vector.load %arg7[%c0_16, %c0_17] : memref<8x256xf32, #tpu.memory_space<vmem>>, vector<8x256xf32>
      tpu.vector_store %arg7[%c0_16, %c0_17], %42 {strides = array<i32>} : memref<8x256xf32, #tpu.memory_space<vmem>>, vector<8x256xf32>,
    } else {
    }
    %c0 = arith.constant 0 : index
    %c0_1 = arith.constant 0 : index
    %c0_2 = arith.constant 0 : index
    %3 = vector.load %arg2[%c0, %c0_1, %c0_2] : memref<1x4x256xf32, #tpu.memory_space<vmem>>, vector<1x4x256xf32>
    %4 = vector.shape_cast %3 : vector<1x4x256xf32> to vector<4x256xf32>
    %c0_3 = arith.constant 0 : index
    %c0_4 = arith.constant 0 : index
    %5 = vector.load %arg3[%c0_3, %c0_4] : memref<8x4xf32, #tpu.memory_space<vmem>>, vector<8x4xf32>
    %c0_5 = arith.constant 0 : index
    %c0_6 = arith.constant 0 : index
    %6 = vector.load %arg4[%c0_5, %c0_6] : memref<8x1xf32, #tpu.memory_space<vmem>>, vector<8x1xf32>
    %c0_7 = arith.constant 0 : index
    %c0_8 = arith.constant 0 : index
    %c0_9 = arith.constant 0 : index
    %7 = vector.load %arg5[%c0_7, %c0_8, %c0_9] : memref<1x8x256xf32, #tpu.memory_space<vmem>>, vector<1x8x256xf32>
    %8 = vector.shape_cast %7 : vector<1x8x256xf32> to vector<8x256xf32>
    %9 = vector.extract_strided_slice %5 {offsets = [0, 0], sizes = [8, 1], strides = [1, 1]} : vector<8x4xf32> to vector<8x1xf32>
    %10 = vector.extract_strided_slice %4 {offsets = [0, 0], sizes = [1, 256], strides = [1, 1]} : vector<4x256xf32> to vector<1x256xf32>
    %11 = vector.broadcast %9 : vector<8x1xf32> to vector<8x256xf32>
    %12 = vector.broadcast %10 : vector<1x256xf32> to vector<8x256xf32>
    %13 = arith.mulf %11, %12 : vector<8x256xf32>
    %14 = vector.extract_strided_slice %5 {offsets = [0, 1], sizes = [8, 1], strides = [1, 1]} : vector<8x4xf32> to vector<8x1xf32>
    %15 = vector.extract_strided_slice %4 {offsets = [1, 0], sizes = [1, 256], strides = [1, 1]} : vector<4x256xf32> to vector<1x256xf32>
    %16 = vector.broadcast %14 : vector<8x1xf32> to vector<8x256xf32>
    %17 = vector.broadcast %15 : vector<1x256xf32> to vector<8x256xf32>
    %18 = arith.mulf %16, %17 : vector<8x256xf32>
    %19 = arith.addf %13, %18 : vector<8x256xf32>
    %20 = vector.extract_strided_slice %5 {offsets = [0, 2], sizes = [8, 1], strides = [1, 1]} : vector<8x4xf32> to vector<8x1xf32>
    %21 = vector.extract_strided_slice %4 {offsets = [2, 0], sizes = [1, 256], strides = [1, 1]} : vector<4x256xf32> to vector<1x256xf32>
    %22 = vector.broadcast %20 : vector<8x1xf32> to vector<8x256xf32>
    %23 = vector.broadcast %21 : vector<1x256xf32> to vector<8x256xf32>
    %24 = arith.mulf %22, %23 : vector<8x256xf32>
    %25 = arith.addf %19, %24 : vector<8x256xf32>
    %26 = vector.extract_strided_slice %5 {offsets = [0, 3], sizes = [8, 1], strides = [1, 1]} : vector<8x4xf32> to vector<8x1xf32>
    %27 = vector.extract_strided_slice %4 {offsets = [3, 0], sizes = [1, 256], strides = [1, 1]} : vector<4x256xf32> to vector<1x256xf32>
    %28 = vector.broadcast %26 : vector<8x1xf32> to vector<8x256xf32>
    %29 = vector.broadcast %27 : vector<1x256xf32> to vector<8x256xf32>
    %30 = arith.mulf %28, %29 : vector<8x256xf32>
    %31 = arith.addf %25, %30 : vector<8x256xf32>
    %32 = vector.broadcast %6 : vector<8x1xf32> to vector<8x256xf32>
    %33 = arith.addf %31, %32 : vector<8x256xf32>
    %34 = arith.subf %33, %8 : vector<8x256xf32>
    %c0_10 = arith.constant 0 : index
    %c0_11 = arith.constant 0 : index
    %35 = vector.load %arg7[%c0_10, %c0_11] : memref<8x256xf32, #tpu.memory_space<vmem>>, vector<8x256xf32>
    %36 = arith.mulf %34, %34 : vector<8x256xf32>
    %37 = arith.addf %35, %36 : vector<8x256xf32>
    %c0_12 = arith.constant 0 : index
    %c0_13 = arith.constant 0 : index
    %38 = vector.load %arg7[%c0_12, %c0_13] : memref<8x256xf32, #tpu.memory_space<vmem>>, vector<8x256xf32>
    tpu.vector_store %arg7[%c0_12, %c0_13], %37 {strides = array<i32>} : memref<8x256xf32, #tpu.memory_space<vmem>>, vector<8x256xf32>,
    %c0_i32_14 = arith.constant 0 : i32
    %39 = arith.cmpi eq, %arg1, %c0_i32_14 : i32
    %40 = arith.extui %39 : i1 to i32
    %c0_i32_15 = arith.constant 0 : i32
    %41 = arith.cmpi ne, %40, %c0_i32_15 : i32
    scf.if %41 {
      %c0_16 = arith.constant 0 : index
      %c0_17 = arith.constant 0 : index
      %42 = vector.load %arg7[%c0_16, %c0_17] : memref<8x256xf32, #tpu.memory_space<vmem>>, vector<8x256xf32>
      %43 = vector.extract_strided_slice %42 {offsets = [0, 0], sizes = [8, 128], strides = [1, 1]} : vector<8x256xf32> to vector<8x128xf32>
      %44 = vector.extract_strided_slice %42 {offsets = [0, 128], sizes = [8, 128], strides = [1, 1]} : vector<8x256xf32> to vector<8x128xf32>
      %45 = arith.addf %43, %44 : vector<8x128xf32>
      %c0_18 = arith.constant 0 : index
      %c0_19 = arith.constant 0 : index
      %c0_20 = arith.constant 0 : index
      %46 = vector.load %arg6[%c0_18, %c0_19, %c0_20] : memref<1x8x128xf32, #tpu.memory_space<vmem>>, vector<1x8x128xf32>
      %47 = vector.shape_cast %46 : vector<1x8x128xf32> to vector<8x128xf32>
      %48 = vector.shape_cast %45 : vector<8x128xf32> to vector<1x8x128xf32>
      tpu.vector_store %arg6[%c0_18, %c0_19, %c0_20], %48 {strides = array<i32>} : memref<1x8x128xf32, #tpu.memory_space<vmem>>, vector<1x8x128xf32>,
    } else {
    }
    return
  }
  func.func @transform_0(%arg0: i32, %arg1: i32) -> (i32, i32, i32) {
    %c0_i32 = arith.constant 0 : i32
    %c0_i32_0 = arith.constant 0 : i32
    return %arg0, %c0_i32, %arg1 : i32, i32, i32
  }
  func.func @transform_1(%arg0: i32, %arg1: i32) -> (i32, i32) {
    %c0_i32 = arith.constant 0 : i32
    %c0_i32_0 = arith.constant 0 : i32
    %c0_i32_1 = arith.constant 0 : i32
    return %c0_i32, %c0_i32_0 : i32, i32
  }
  func.func @transform_2(%arg0: i32, %arg1: i32) -> (i32, i32) {
    %c0_i32 = arith.constant 0 : i32
    %c0_i32_0 = arith.constant 0 : i32
    %c0_i32_1 = arith.constant 0 : i32
    return %c0_i32, %c0_i32_0 : i32, i32
  }
  func.func @transform_3(%arg0: i32, %arg1: i32) -> (i32, i32, i32) {
    %c0_i32 = arith.constant 0 : i32
    %c0_i32_0 = arith.constant 0 : i32
    return %arg0, %c0_i32, %arg1 : i32, i32, i32
  }
  func.func @transform_4(%arg0: i32, %arg1: i32) -> (i32, i32, i32) {
    %c0_i32 = arith.constant 0 : i32
    %c0_i32_0 = arith.constant 0 : i32
    %c0_i32_1 = arith.constant 0 : i32
    return %arg0, %c0_i32, %c0_i32_0 : i32, i32, i32
  }
}

</mosaic_0001>

<bundles_post_ra>
// kernel: tpu_custom_call.1
= control target key start
LH: loop header
LB: loop body
LE: loop exit
PB: predicated region body
PF: predicated region fallthrough
CT: control target
= control target key end

     0   :  { %9 = vsyncpa [#allocation4], 0  ;;  %s941_s0 = inlined_call_operand.hbm [shape: f32[2,4,256], index: 0, kind: input, shape index: {}]   ;;  %s942_s1 = inlined_call_operand.vmem [shape: f32[8,4], index: 1, kind: input, shape index: {}]   ;;  %s943_s2 = inlined_call_operand.vmem [shape: f32[8,1], index: 2, kind: input, shape index: {}]   ;;  %s944_s3 = inlined_call_operand.vmem [shape: f32[2,8,256], index: 3, kind: input, shape index: {}]   ;;  %s945_s4 = inlined_call_operand.hbm [shape: f32[2,8,128], index: 4, kind: output, shape index: {}]  }
   0x1   :  { %11 = vsyncpa [#allocation4 + $0x1], 0 }
   0x2   :  { %12 = vsyncpa [#allocation5], 0 }
   0x3   :  { %14 = vsyncpa [#allocation5 + $0x1], 0  ;;  %s754_s15 = smov 0   ;;  %s756_s16 = smov 0  }
   0x4   :  { %s758_s17 = smov 0   ;;  %s760_s18 = smov 0  }
   0x5   :  { %s762_s19 = smov 0   ;;  %s764_s20 = smov 0  }
   0x6 LB: > { %s519_s21 = sadd.s32 4294967295, %s721_s20   ;;  %s520_s22 = sadd.s32 4294967294, %s721_s20   ;;  %s721_s20 = sphi %s764_s20, %s20_s20   ;;  %s717_s19 = sphi %s762_s19, %s961_s19   ;;  %s713_s18 = sphi %s760_s18, %s960_s18   ;;  %s709_s17 = sphi %s758_s17, %s959_s17   ;;  %s705_s16 = sphi %s756_s16, %s958_s16   ;;  %s701_s15 = sphi %s754_s15, %s957_s15  }
   0x7   : > { %s32_s23 = sadd.s32 1, %s717_s19  ;;  %s41_s24 = sadd.s32 1, %s709_s17 }
   0x8   : > { %p34_p0 = scmp.ge.s32.totalorder %s32_s23, 2  ;;  %p48_p1 = scmp.ne.s32.totalorder %s709_s17, %s705_s16 }
   0x9   : > { %p49_p2 = scmp.eq.s32.totalorder %s721_s20, 0  ;;  %p54_p3 = scmp.ne.s32.totalorder %s705_s16, %s701_s15 }
   0xa   : > { %s963_s23 = smov (%p34_p0, %s32_s23), 0  ;;  %p55_p5 = scmp.eq.s32.totalorder %s519_s21, 0 }
   0xb   : > { %p795_p4 = por %p49_p2, %p48_p1  ;;  %s36_s26 = ssub.s32 %s717_s19, %s963_s23 }
   0xc   : > { %p148_p6 = scmp.eq.s32.totalorder %s519_s21, 1  ;;  %p39_p7 = scmp.eq.s32.totalorder %s36_s26, 0 }
   0xd   : > { %p801_p8 = por %p55_p5, %p54_p3  ;;  %p154_p10 = scmp.eq.s32.totalorder %s520_s22, 1 }
   0xe   : > { %p805_p9 = por %p148_p6, %p48_p1  ;;  %p549_p13 = scmp.lt.s32.totalorder %s721_s20, 2 }
   0xf   : > { %s810_s29 = scalar_select %p39_p7, %s709_s17, %s41_s24  }
  0x10   : > { %s949_s28 = scalar_select %p805_p9, 1, 0 }
  0x11   : > { %p812_p11 = por %p154_p10, %p54_p3  ;;  %s180_s5 = sand.u32 1, %s709_s17  }
  0x12   : > { %s523_s6 = sshll.u32 %s180_s5, 3  ;;  %s535_s7 = sshll.u32 %s717_s19, 7 }
  0x13   : > { %s950_s30 = scalar_select %p812_p11, 1, 0 }
  0x14   : > { %s823_s10 = scalar_lea.hbm %s941_s0, %s535_s7  ;;  %s184_s11 = scalar_lea.vmem [#allocation3], %s523_s6 }
  0x15   : > { %s194_s12 = sshll.u32 %s184_s11, 4  ;;  %p829_p0 = pnand %p549_p13, %p795_p4  ;;  %s825_s12 = int_to_ptr.vmem [resolvable:$true] %s194_s12 }
  0x16   : > { %s181_s14 = scalar_lea.sflag [#allocation4], %s180_s5  ;;  %s609_s21 = scalar_lea.hbm %s823_s10, 128 }
  0x17   : > { %p610_p3 = scmp.ne.s32.totalorder %s823_s10, %s609_s21  ;;  %p611_p5 = pneg %p829_p0 }
  0x18   : > { %s614_s25 = scalar_lea.hbm %s941_s0, 256  ;;  %p615_p4 = scmp.lt.u32.totalorder %s823_s10, %s941_s0 }
  0x19   : > { %p612_p6 = pnand %p611_p5, %p610_p3  ;;  %p616_p10 = scmp.lt.u32.totalorder %s614_s25, %s609_s21 }
  0x1a   : > { %p618_p12 = scmp.lt.u32.totalorder %s609_s21, %s823_s10 }
  0x1b   : > { %p613_p7 = pneg %p612_p6  ;;  %p617_p13 = por %p616_p10, %p615_p4 }
  0x1d   : > { %p619_p1 = por %p618_p12, %p617_p13 }
  0x1f   : > { %p620_p2 = pnand %p619_p1, %p613_p7 }
  0x21   : > { %623 = shalt.err (!%p620_p2)
}
  0x22   : > { %s624_s5 = scalar_lea.vmem %s825_s12, 128  ;;  %s723_s7 = smov [#allocation3]  }
  0x23   : > { %p625_p3 = scmp.ne.s32.totalorder %s825_s12, %s624_s5  ;;  %s629_s8 = sshll.u32 %s723_s7, 4  ;;  %s630_s8 = int_to_ptr.vmem [resolvable:$false] %s629_s8 }
  0x24   : > { %s631_s9 = scalar_lea.vmem %s630_s8, 256  ;;  %p632_p9 = scmp.lt.s32.totalorder %s825_s12, %s630_s8 }
  0x25   : > { %p627_p6 = pnand %p625_p3, %p611_p5  ;;  %p633_p4 = scmp.lt.s32.totalorder %s631_s9, %s624_s5 }
  0x27   : > { %p628_p11 = pneg %p627_p6  ;;  %p634_p10 = por %p633_p4, %p632_p9 }
  0x29   : > { %p635_p12 = pnand %p634_p10, %p628_p11 }
  0x2b   : > { %638 = shalt.err (!%p635_p12)
}
  0x2c   : > { %544 = dma.hbm_to_vmem [thread:$0]  (!%p829_p0), %s823_s10, 128, %s825_s12, %s181_s14  }
  0x2d   : > { %p952_p1 = scmp.lt.s32.totalorder %s721_s20, 3  ;;  %p953_p2 = scmp.ge.s32.totalorder %s721_s20, 1 }
  0x2f   : > { %p213_p5 = pnand %p953_p2, %p952_p1 }
  0x30   : > { %s865_s11 = sand.u32 (!%p213_p5), 1, %s705_s16  }
  0x31   : > { %216 = sbr.rel (%p213_p5) target bundleno = 222 (0xde), region = 36  ;;  %s527_s21 = sshll.u32 (!%p213_p5), %s865_s11, 3 }
  0x32   : > { %s219_s22 = scalar_lea.sflag (!%p213_p5), [#allocation4], %s865_s11  ;;  %s222_s13 = scalar_lea.vmem (!%p213_p5), [#allocation3], %s527_s21 }
  0x38   : > { %692 = dma.done.wait (%p801_p8), %s219_s22, 128  }
  0x39   : > { %694 = vsyncadd (%p801_p8), %s219_s22, 4294967168  ;;  %v724_v0 = vmov 0   ;;  %v725_v1 = vmov 2   ;;  %v274_v2 = vld [vmem:[%s942_s1] sm:$0xff]  ;;  %v726_v3 = vmov 1   ;;  %v727_v4 = vmov 3  }
  0x3a   : > { %603 = vset.pattern.permute.xlu0 %v724_v0  ;;  %605 = vset.pattern.permute.xlu1 %v725_v1  ;;  %v275_v5 = vld [vmem:[%s943_s2] sm:$0xff]  ;;  %v284_v6 = vlaneseq  ;;  %p258_p8 = scmp.lt.s32.totalorder %s713_s18, 1  ;;  %s532_s7 = sshll.u32 %s713_s18, 7 }
  0x3b   : > { %280 = vperm.xlu0 %603, %v274_v2   ;;  %331 = vperm.xlu1 %605, %v274_v2   ;;  %v273_v12 = vld [vmem:[%s222_s13] sm:$0xff]  ;;  %s255_s8 = scalar_lea.vmem [#allocation6], %s527_s21  ;;  %s892_s10 = scalar_lea.hbm %s945_s4, %s532_s7 }
  0x3c   : > { %v285_v7 = vshrl.u32 %v284_v6, 7  ;;  %s259_s27 = scalar_select %p258_p8, %s713_s18, 1 }
  0x3d   : > { %s420_s9 = sshll.u32 %s255_s8, 4  ;;  %s407_s12 = scalar_lea.sflag [#allocation5], %s865_s11  ;;  %s894_s9 = int_to_ptr.vmem [resolvable:$true] %s420_s9 }
  0x3e   : > { %v286_v8 = vsub.s32 0, %v285_v7  ;;  %v290_v9 = vsub.s32 4, %v285_v7  ;;  %v310_v10 = vsub.s32 1, %v285_v7  ;;  %v314_v11 = vsub.s32 5, %v285_v7  ;;  %s536_s25 = sshll.u32 %s259_s27, 4  ;;  %s639_s14 = scalar_lea.vmem %s894_s9, 128 }
  0x3f   : > { %604 = vset.pattern.permute.xlu0 %v726_v3  ;;  %606 = vset.pattern.permute.xlu1 %v727_v4  ;;  %v336_v13 = vsub.s32 2, %v285_v7  ;;  %v340_v14 = vsub.s32 6, %v285_v7  ;;  %v362_v15 = vsub.s32 3, %v285_v7  ;;  %v366_v16 = vsub.s32 7, %v285_v7  ;;  %s265_s5 = scalar_lea.vmem %s944_s3, %s536_s25  ;;  %p640_p9 = scmp.ne.s32.totalorder %s894_s9, %s639_s14 }
  0x40   : > { %305 = vperm.xlu0 %604, %v274_v2   ;;  %357 = vperm.xlu1 %606, %v274_v2   ;;  %v287_v17 = vrot.slane %v273_v12, %v286_v8  ;;  %v291_v18 = vrot.slane %v273_v12, %v290_v9  ;;  %v311_v19 = vrot.slane %v273_v12, %v310_v10  ;;  %v276_v52 = vld [vmem:[%s265_s5] sm:$0xff]  ;;  %v277_v53 = vld [vmem:[%s265_s5 + $0x8] sm:$0xff]  ;;  %p954_p11 = scmp.ne.s32.totalorder %s949_s28, 0  ;;  %s728_s18 = smov [#allocation6]  }
  0x41   : > { %v315_v20 = vrot.slane %v273_v12, %v314_v11  ;;  %v337_v21 = vrot.slane %v273_v12, %v336_v13  ;;  %v341_v22 = vrot.slane %v273_v12, %v340_v14  ;;  %v363_v25 = vrot.slane %v273_v12, %v362_v15  ;;  %s643_s21 = sshll.u32 %s728_s18, 4  ;;  %s644_s21 = int_to_ptr.vmem [resolvable:$false] %s643_s21 }
  0x42   : > { %v367_v26 = vrot.slane %v273_v12, %v366_v16  ;;  %v297_v27 = vrot.slane %v287_v17, %v286_v8  ;;  %v301_v28 = vrot.slane %v291_v18, %v286_v8  ;;  %v321_v29 = vrot.slane %v311_v19, %v310_v10  ;;  %p641_p0 = pnand %p640_p9, %p954_p11  ;;  %s645_s24 = scalar_lea.vmem %s644_s21, 256 }
  0x43   : > { %v325_v30 = vrot.slane %v315_v20, %v310_v10  ;;  %v347_v31 = vrot.slane %v337_v21, %v336_v13  ;;  %v351_v32 = vrot.slane %v341_v22, %v336_v13  ;;  %v373_v33 = vrot.slane %v363_v25, %v362_v15  ;;  %p646_p13 = scmp.lt.s32.totalorder %s894_s9, %s644_s21  ;;  %p647_p3 = scmp.lt.s32.totalorder %s645_s24, %s639_s14 }
  0x44   : > { %607 = vset.pattern.permute.xlu1 %v724_v0  ;;  %608 = vset.pattern.permute.xlu0 %v724_v0  ;;  %v377_v34 = vrot.slane %v367_v26, %v362_v15  ;;  %p642_p7 = pneg %p641_p0 }
  0x45   : > { %384 = vperm.xlu1 %607, %v275_v5   ;;  %p648_p6 = por %p647_p3, %p646_p13 }
  0x47   : > { %p649_p4 = pnand %p648_p6, %p642_p7 }
  0xba   : > { %v281_v23 = vpop.permute.xlu0 %280  ;;  %v332_v24 = vpop.permute.xlu1 %331 }
  0xbb   : > { %v302_v37 = vmul.f32 %v297_v27, %v281_v23  ;;  %v303_v38 = vmul.f32 %v301_v28, %v281_v23  ;;  %v352_v41 = vmul.f32 %v347_v31, %v332_v24  ;;  %v353_v42 = vmul.f32 %v351_v32, %v332_v24 }
  0xbf   : > { %v306_v35 = vpop.permute.xlu0 %305  ;;  %v358_v36 = vpop.permute.xlu1 %357 }
  0xc0   : > { %v326_v39 = vmul.f32 %v321_v29, %v306_v35  ;;  %v327_v40 = vmul.f32 %v325_v30, %v306_v35  ;;  %v378_v45 = vmul.f32 %v373_v33, %v358_v36  ;;  %v379_v46 = vmul.f32 %v377_v34, %v358_v36 }
  0xc2   : > { %v328_v43 = vadd.f32 %v326_v39, %v302_v37  ;;  %v329_v44 = vadd.f32 %v327_v40, %v303_v38 }
  0xc4   : > { %v354_v47 = vadd.f32 %v352_v41, %v328_v43  ;;  %v355_v48 = vadd.f32 %v353_v42, %v329_v44  ;;  %v385_v49 = vpop.permute.xlu1 %384 }
  0xc6   : > { %v380_v50 = vadd.f32 %v378_v45, %v354_v47  ;;  %v381_v51 = vadd.f32 %v379_v46, %v355_v48 }
  0xc8   : > { %v387_v54 = vadd.f32 %v385_v49, %v380_v50  ;;  %v388_v55 = vadd.f32 %v385_v49, %v381_v51 }
  0xca   : > { %v389_v56 = vsub.f32 %v387_v54, %v276_v52  ;;  %v390_v57 = vsub.f32 %v388_v55, %v277_v53 }
  0xcc   : > { %v393_v58 = vmul.f32 %v389_v56, %v389_v56  ;;  %v394_v59 = vmul.f32 %v390_v57, %v390_v57 }
  0xce   : > { %v404_v60 = vadd.f32 %v394_v59, %v393_v58 }
  0xd0   : > { %405 = vst [vmem:[%s255_s8] sm:$0xff] %v404_v60 }
  0xd1   : > { %652 = shalt.err (!%p649_p4)
}
  0xd2   : > { %s653_s11 = scalar_lea.hbm %s892_s10, 128  ;;  %s657_s26 = scalar_lea.hbm %s945_s4, 256 }
  0xd3   : > { %p654_p10 = scmp.ne.s32.totalorder %s892_s10, %s653_s11  ;;  %p658_p2 = scmp.lt.u32.totalorder %s892_s10, %s945_s4 }
  0xd4   : > { %p659_p5 = scmp.lt.u32.totalorder %s657_s26, %s653_s11  ;;  %p661_p9 = scmp.lt.u32.totalorder %s653_s11, %s892_s10 }
  0xd5   : > { %p655_p12 = pnand %p654_p10, %p954_p11 }
  0xd6   : > { %p660_p8 = por %p659_p5, %p658_p2 }
  0xd7   : > { %p656_p1 = pneg %p655_p12 }
  0xd8   : > { %p662_p0 = por %p661_p9, %p660_p8 }
  0xda   : > { %p663_p7 = pnand %p662_p0, %p656_p1 }
  0xdc   : > { %666 = shalt.err (!%p663_p7)
}
  0xdd   : > { %539 = dma.vmem_to_hbm [thread:$0]  (%p954_p11), %s894_s9, 128, %s892_s10, %s407_s12  }
  0xde PF: > { %s432_s7 = sand.u32 1, %s701_s15   ;;  %p955_p13 = scmp.ne.s32.totalorder %s950_s30, 0 }
  0xdf   : > { %p956_p3 = scmp.ge.s32.totalorder %s721_s20, 2  ;;  %s433_s8 = scalar_lea.sflag [#allocation5], %s432_s7 }
  0xe1   : > { %p546_p6 = pnand %p956_p3, %p955_p13 }
  0xe3   : > { %696 = dma.done.wait (!%p546_p6), %s433_s8, 128  }
  0xe4   : > { %698 = vsyncadd (!%p546_p6), %s433_s8, 4294967168  ;;  %s20_s20 = sadd.s32 1, %s721_s20   ;;  %s957_s15 = smov %s705_s16 }
  0xe5   : > { %p17_p4 = scmp.ge.s32.totalorder %s20_s20, 4   ;;  %s958_s16 = smov %s709_s17 }
  0xe6   : > { %s959_s17 = smov %s810_s29  ;;  %s960_s18 = smov %s717_s19 }
  0xe7   : > { %s961_s19 = smov %s963_s23  ;;  %19 = sbr.rel (!%p17_p4) target bundleno = 6 (0x6), region = 92 }
  0xee   :  { %438 = vsyncpa [#allocation4], 1 }
  0xef   :  { %440 = vsyncpa [#allocation4 + $0x1], 1 }
  0xf0   :  { %441 = vsyncpa [#allocation5], 1 }
  0xf1   :  { %443 = vsyncpa [#allocation5 + $0x1], 1 }

</bundles_post_ra>
